<compile_context>
chip_gen: v7x
topology: tpu7x:2x2x1
jax: 0.10.0
libtpu: 0.0.40
codegen_flags: <defaults>
</compile_context>

<pallas_src>
import functools

import jax
import jax.numpy as jnp
from jax.experimental import pallas as pl
from jax.experimental.pallas import tpu as pltpu


def _conv3x3_kernel(x_ref, w_ref, b_ref, o_ref, patch_ref, *, H, W):
    """3x3 / pad=1 conv on B_TILE fused images via one im2col MXU matmul.

    x_ref     : (B_TILE, Cin, H*W)    input slab (channels on sublanes, pixels on lanes)
    w_ref     : (Cout, 9*Cin)         weights, tap-major / channel-minor contraction
    b_ref     : (Cout, 1)             bias column
    o_ref     : (B_TILE, Cout, H*W)   output slab (lane-dense stores, H*W % 128 == 0)
    patch_ref : (9*Cin, B_TILE*H*W)   VMEM scratch: fused im2col patch
    """
    b_tile, cin, hw = x_ref.shape
    pdt = patch_ref.dtype

    # Hoisted border masks: 4 compares on a (1, HW) iota, shared by every tap /
    # batch / channel (jnp.where broadcasts them over the Cin sublanes).
    pos = jax.lax.broadcasted_iota(jnp.int32, (1, hw), 1)
    col = pos % W                        # W is a power of two here -> bitwise AND
    row_ok = {-1: pos >= W,              # tap row h-1 >= 0
              0: None,
              1: pos < (H - 1) * W}      # tap row h+1 <= H-1
    col_ok = {-1: col >= 1,              # tap col w-1 >= 0
              0: None,
              1: col < (W - 1)}          # tap col w+1 <= W-1

    # im2col: write each masked tap straight into the fused patch exactly once.
    # Off-centre taps are lane rotations (XLU) of the input slab; the masks zero
    # exactly the out-of-image / wrap-around / cross-image lanes.
    for b in range(b_tile):
        xb = x_ref[b].astype(pdt)        # (Cin, HW)
        lane0 = b * hw
        for kh in range(3):
            for kw in range(3):
                dh, dw = kh - 1, kw - 1
                d = dh * W + dw          # flat pixel shift of this tap
                if d == 0:
                    tap = xb             # centre tap: no roll, no mask
                else:
                    shifted = pltpu.roll(xb, (-d) % hw, axis=1)
                    rm, cm = row_ok[dh], col_ok[dw]
                    if rm is None:
                        m = cm
                    elif cm is None:
                        m = rm
                    else:
                        m = rm & cm
                    tap = jnp.where(m, shifted, jnp.zeros_like(shifted))
                t = kh * 3 + kw
                patch_ref[t * cin:(t + 1) * cin, lane0:lane0 + hw] = tap

    # Single lane-dense MXU matmul over the fused batch; f32 accumulation.
    acc = jnp.dot(w_ref[...], patch_ref[...],
                  preferred_element_type=jnp.float32)
    acc = acc + b_ref[...]               # (Cout, 1) broadcast over all lanes

    for b in range(b_tile):              # lane-aligned (multiple-of-HW) slices
        o_ref[b] = acc[:, b * hw:(b + 1) * hw].astype(o_ref.dtype)


def prepare_outconv_params(weight_oihw, bias, *, param_dtype=None):
    """One-off (hoisted) parameter prep: OIHW -> (Cout, 9*Cin), bias -> column.

    Pass param_dtype=jnp.bfloat16 on v6e/v7x for the MXU-native bf16 operand
    path (halves patch VMEM / DMA bytes); accumulation stays f32 either way.
    """
    cout, cin = weight_oihw.shape[0], weight_oihw.shape[1]
    w_flat = jnp.transpose(weight_oihw, (0, 2, 3, 1)).reshape(cout, 9 * cin)
    if param_dtype is not None:
        w_flat = w_flat.astype(param_dtype)
    b_col = bias.reshape(cout, 1).astype(jnp.float32)
    return w_flat, b_col


def outconv_forward(x_nchw, w_flat, b_col):
    """Equivalent of `nn.Conv2d(in_ch, out_ch, 3, padding=1)(x)` (NCHW in/out)."""
    N, Cin, H, W = x_nchw.shape
    Cout = w_flat.shape[0]
    HW = H * W

    # Metadata-only reshape (no transpose, no pad).
    x_flat = x_nchw.reshape(N, Cin, HW)

    # Batch tiling: fuse B_TILE images per grid step onto the lane axis, but
    # keep 2 "parallel" grid steps when possible so both v7x TensorCores get
    # work (on v5e/v6e the grid is a short sequential loop either way).
    if N >= 2 and N % 2 == 0:
        n_steps, b_tile = 2, N // 2
    else:
        n_steps, b_tile = N, 1

    patch_dtype = w_flat.dtype
    x_bytes = jnp.dtype(x_nchw.dtype).itemsize
    p_bytes = jnp.dtype(patch_dtype).itemsize
    need = (2 * b_tile * Cin * HW * x_bytes        # input block (double-buffered)
            + 2 * b_tile * Cout * HW * x_bytes     # output block (double-buffered)
            + 2 * Cout * 9 * Cin * p_bytes         # weights
            + 9 * Cin * b_tile * HW * p_bytes      # im2col patch scratch
            + (1 << 20))                           # headroom
    vmem_limit = int(min(64 << 20, max(16 << 20, 2 * need)))

    kernel = functools.partial(_conv3x3_kernel, H=H, W=W)

    # TODO(synk): for large Cin*H*W (esp. v7x's 64 MiB VMEM) tile H into row
    # strips with a 1-row halo on a second grid axis (or accumulate 3 tap-row
    # matmul strips) instead of materialising the full 9x patch per step.
    out_flat = pl.pallas_call(
        kernel,
        out_shape=jax.ShapeDtypeStruct((N, Cout, HW), x_nchw.dtype),
        grid=(n_steps,),
        in_specs=[
            pl.BlockSpec((b_tile, Cin, HW), lambda n: (n, 0, 0)),
            pl.BlockSpec((Cout, 9 * Cin), lambda n: (0, 0)),
            pl.BlockSpec((Cout, 1), lambda n: (0, 0)),
        ],
        out_specs=pl.BlockSpec((b_tile, Cout, HW), lambda n: (n, 0, 0)),
        scratch_shapes=[
            pltpu.VMEM((9 * Cin, b_tile * HW), patch_dtype),
        ],
        compiler_params=pltpu.CompilerParams(
            dimension_semantics=("parallel",),
            vmem_limit_bytes=vmem_limit),
    )(x_flat, w_flat, b_col)

    # Metadata-only reshape back to NCHW.
    return out_flat.reshape(N, Cout, H, W)


if __name__ == "__main__":
    # outconv(in_ch=4, out_ch=8) on a (2, 4, 16, 16) input.
    in_ch, out_ch = 4, 8
    N, H, W = 2, 16, 16

    key = jax.random.PRNGKey(0)
    k_x, k_w, k_b = jax.random.split(key, 3)

    x = jax.random.normal(k_x, (N, in_ch, H, W), dtype=jnp.float32)
    # Deterministic synthetic params (PyTorch-shape Conv2d weights: OIHW).
    fan_in = in_ch * 3 * 3
    bound = 1.0 / (fan_in ** 0.5)
    weight = jax.random.uniform(k_w, (out_ch, in_ch, 3, 3),
                                minval=-bound, maxval=bound, dtype=jnp.float32)
    bias = jax.random.uniform(k_b, (out_ch,),
                              minval=-bound, maxval=bound, dtype=jnp.float32)

    w_flat, b_col = prepare_outconv_params(weight, bias)   # hoisted param prep
    fwd = jax.jit(outconv_forward)

    out = jax.block_until_ready(fwd(x, w_flat, b_col))

    def torch_conv_ref(xi):
        r = jax.lax.conv_general_dilated(
            xi, weight, window_strides=(1, 1), padding=((1, 1), (1, 1)),
            dimension_numbers=("NCHW", "OIHW", "NCHW"))
        return r + bias[None, :, None, None]

    assert out.shape == (N, out_ch, H, W)
    assert jnp.allclose(out, torch_conv_ref(x), atol=1e-4, rtol=1e-4)

    # Also exercise the fused-batch path (B_TILE = 2 images per grid step).
    x4 = jax.random.normal(jax.random.PRNGKey(1), (4, in_ch, H, W),
                           dtype=jnp.float32)
    out4 = jax.block_until_ready(fwd(x4, w_flat, b_col))
    assert jnp.allclose(out4, torch_conv_ref(x4), atol=1e-4, rtol=1e-4)

    print("KERNEL_OK")
</pallas_src>

<mosaic_0001>
module attributes {stable_mosaic.version = 11 : i64} {
  func.func @_conv3x3_kernel(%arg0: i32, %arg1: memref<1x4x256xf32, #tpu.memory_space<vmem>>, %arg2: memref<8x36xf32, #tpu.memory_space<vmem>>, %arg3: memref<8x1xf32, #tpu.memory_space<vmem>>, %arg4: memref<1x8x256xf32, #tpu.memory_space<vmem>>, %arg5: memref<36x256xf32, #tpu.memory_space<vmem>>) attributes {dimension_semantics = [#tpu.dimension_semantics<parallel>], iteration_bounds = array<i64: 2>, scalar_prefetch = 0 : i64, scratch_operands = 1 : i64, tpu.core_type = #tpu.core_type<tc>, window_params = [{transform_indices = @transform_0, window_bounds = array<i64: 1, 4, 256>}, {pipeline_mode = #tpu.pipeline_mode<synchronous>, transform_indices = @transform_1, window_bounds = array<i64: 8, 36>}, {pipeline_mode = #tpu.pipeline_mode<synchronous>, transform_indices = @transform_2, window_bounds = array<i64: 8, 1>}, {transform_indices = @transform_3, window_bounds = array<i64: 1, 8, 256>}]} {
    %0 = tpu.iota {dimensions = array<i32: 1>} : vector<1x256xi32>
    %c16_i32 = arith.constant 16 : i32
    %c0_i32 = arith.constant 0 : i32
    %1 = arith.cmpi eq, %c16_i32, %c0_i32 : i32
    %c1_i32 = arith.constant 1 : i32
    %2 = arith.select %1, %c1_i32, %c16_i32 : i32
    %3 = vector.broadcast %2 : i32 to vector<1x256xi32>
    %4 = arith.remsi %0, %3 : vector<1x256xi32>
    %c0_i32_0 = arith.constant 0 : i32
    %5 = vector.broadcast %c0_i32_0 : i32 to vector<1x256xi32>
    %6 = arith.cmpi ne, %4, %5 : vector<1x256xi32>
    %c0_i32_1 = arith.constant 0 : i32
    %7 = vector.broadcast %c0_i32_1 : i32 to vector<1x256xi32>
    %8 = arith.cmpi slt, %4, %7 : vector<1x256xi32>
    %c0_i32_2 = arith.constant 0 : i32
    %9 = arith.cmpi slt, %2, %c0_i32_2 : i32
    %10 = vector.broadcast %9 : i1 to vector<1x256xi1>
    %11 = vector.broadcast %10 : vector<1x256xi1> to vector<1x256xi1>
    %12 = arith.xori %8, %11 : vector<1x256xi1>
    %13 = arith.andi %12, %6 : vector<1x256xi1>
    %14 = vector.broadcast %2 : i32 to vector<1x256xi32>
    %15 = arith.addi %4, %14 : vector<1x256xi32>
    %16 = arith.select %13, %15, %4 : vector<1x256xi1>, vector<1x256xi32>
    %c16_i32_3 = arith.constant 16 : i32
    %17 = vector.broadcast %c16_i32_3 : i32 to vector<1x256xi32>
    %18 = arith.cmpi sge, %0, %17 : vector<1x256xi32>
    %c240_i32 = arith.constant 240 : i32
    %19 = vector.broadcast %c240_i32 : i32 to vector<1x256xi32>
    %20 = arith.cmpi slt, %0, %19 : vector<1x256xi32>
    %c1_i32_4 = arith.constant 1 : i32
    %21 = vector.broadcast %c1_i32_4 : i32 to vector<1x256xi32>
    %22 = arith.cmpi sge, %16, %21 : vector<1x256xi32>
    %c15_i32 = arith.constant 15 : i32
    %23 = vector.broadcast %c15_i32 : i32 to vector<1x256xi32>
    %24 = arith.cmpi slt, %16, %23 : vector<1x256xi32>
    %c0 = arith.constant 0 : index
    %c0_5 = arith.constant 0 : index
    %c0_6 = arith.constant 0 : index
    %25 = vector.load %arg1[%c0, %c0_5, %c0_6] : memref<1x4x256xf32, #tpu.memory_space<vmem>>, vector<1x4x256xf32>
    %26 = vector.shape_cast %25 : vector<1x4x256xf32> to vector<4x256xf32>
    %c17_i32 = arith.constant 17 : i32
    %27 = tpu.dynamic_rotate %26 by %c17_i32 dim 1 : vector<4x256xf32>, i32 -> vector<4x256xf32>
    %28 = arith.andi %18, %22 : vector<1x256xi1>
    %cst = arith.constant 0.000000e+00 : f32
    %29 = vector.broadcast %cst : f32 to vector<4x256xf32>
    %30 = vector.shape_cast %28 : vector<1x256xi1> to vector<1x256xi1>
    %31 = vector.broadcast %30 : vector<1x256xi1> to vector<4x256xi1>
    %32 = arith.select %31, %27, %29 : vector<4x256xi1>, vector<4x256xf32>
    %c0_7 = arith.constant 0 : index
    %c0_8 = arith.constant 0 : index
    %33 = vector.load %arg5[%c0_7, %c0_8] : memref<36x256xf32, #tpu.memory_space<vmem>>, vector<4x256xf32>
    tpu.vector_store %arg5[%c0_7, %c0_8], %32 {strides = array<i32>} : memref<36x256xf32, #tpu.memory_space<vmem>>, vector<4x256xf32>,
    %c16_i32_9 = arith.constant 16 : i32
    %34 = tpu.dynamic_rotate %26 by %c16_i32_9 dim 1 : vector<4x256xf32>, i32 -> vector<4x256xf32>
    %cst_10 = arith.constant 0.000000e+00 : f32
    %35 = vector.broadcast %cst_10 : f32 to vector<4x256xf32>
    %36 = vector.shape_cast %18 : vector<1x256xi1> to vector<1x256xi1>
    %37 = vector.broadcast %36 : vector<1x256xi1> to vector<4x256xi1>
    %38 = arith.select %37, %34, %35 : vector<4x256xi1>, vector<4x256xf32>
    %c4 = arith.constant 4 : index
    %c0_11 = arith.constant 0 : index
    %39 = vector.load %arg5[%c4, %c0_11] : memref<36x256xf32, #tpu.memory_space<vmem>>, vector<4x256xf32>
    tpu.vector_store %arg5[%c4, %c0_11], %38 {strides = array<i32>} : memref<36x256xf32, #tpu.memory_space<vmem>>, vector<4x256xf32>,
    %c15_i32_12 = arith.constant 15 : i32
    %40 = tpu.dynamic_rotate %26 by %c15_i32_12 dim 1 : vector<4x256xf32>, i32 -> vector<4x256xf32>
    %41 = arith.andi %18, %24 : vector<1x256xi1>
    %cst_13 = arith.constant 0.000000e+00 : f32
    %42 = vector.broadcast %cst_13 : f32 to vector<4x256xf32>
    %43 = vector.shape_cast %41 : vector<1x256xi1> to vector<1x256xi1>
    %44 = vector.broadcast %43 : vector<1x256xi1> to vector<4x256xi1>
    %45 = arith.select %44, %40, %42 : vector<4x256xi1>, vector<4x256xf32>
    %c8 = arith.constant 8 : index
    %c0_14 = arith.constant 0 : index
    %46 = vector.load %arg5[%c8, %c0_14] : memref<36x256xf32, #tpu.memory_space<vmem>>, vector<4x256xf32>
    tpu.vector_store %arg5[%c8, %c0_14], %45 {strides = array<i32>} : memref<36x256xf32, #tpu.memory_space<vmem>>, vector<4x256xf32>,
    %c1_i32_15 = arith.constant 1 : i32
    %47 = tpu.dynamic_rotate %26 by %c1_i32_15 dim 1 : vector<4x256xf32>, i32 -> vector<4x256xf32>
    %cst_16 = arith.constant 0.000000e+00 : f32
    %48 = vector.broadcast %cst_16 : f32 to vector<4x256xf32>
    %49 = vector.shape_cast %22 : vector<1x256xi1> to vector<1x256xi1>
    %50 = vector.broadcast %49 : vector<1x256xi1> to vector<4x256xi1>
    %51 = arith.select %50, %47, %48 : vector<4x256xi1>, vector<4x256xf32>
    %c12 = arith.constant 12 : index
    %c0_17 = arith.constant 0 : index
    %52 = vector.load %arg5[%c12, %c0_17] : memref<36x256xf32, #tpu.memory_space<vmem>>, vector<4x256xf32>
    tpu.vector_store %arg5[%c12, %c0_17], %51 {strides = array<i32>} : memref<36x256xf32, #tpu.memory_space<vmem>>, vector<4x256xf32>,
    %c16 = arith.constant 16 : index
    %c0_18 = arith.constant 0 : index
    %53 = vector.load %arg5[%c16, %c0_18] : memref<36x256xf32, #tpu.memory_space<vmem>>, vector<4x256xf32>
    tpu.vector_store %arg5[%c16, %c0_18], %26 {strides = array<i32>} : memref<36x256xf32, #tpu.memory_space<vmem>>, vector<4x256xf32>,
    %c255_i32 = arith.constant 255 : i32
    %54 = tpu.dynamic_rotate %26 by %c255_i32 dim 1 : vector<4x256xf32>, i32 -> vector<4x256xf32>
    %cst_19 = arith.constant 0.000000e+00 : f32
    %55 = vector.broadcast %cst_19 : f32 to vector<4x256xf32>
    %56 = vector.shape_cast %24 : vector<1x256xi1> to vector<1x256xi1>
    %57 = vector.broadcast %56 : vector<1x256xi1> to vector<4x256xi1>
    %58 = arith.select %57, %54, %55 : vector<4x256xi1>, vector<4x256xf32>
    %c20 = arith.constant 20 : index
    %c0_20 = arith.constant 0 : index
    %59 = vector.load %arg5[%c20, %c0_20] : memref<36x256xf32, #tpu.memory_space<vmem>>, vector<4x256xf32>
    tpu.vector_store %arg5[%c20, %c0_20], %58 {strides = array<i32>} : memref<36x256xf32, #tpu.memory_space<vmem>>, vector<4x256xf32>,
    %c241_i32 = arith.constant 241 : i32
    %60 = tpu.dynamic_rotate %26 by %c241_i32 dim 1 : vector<4x256xf32>, i32 -> vector<4x256xf32>
    %61 = arith.andi %20, %22 : vector<1x256xi1>
    %cst_21 = arith.constant 0.000000e+00 : f32
    %62 = vector.broadcast %cst_21 : f32 to vector<4x256xf32>
    %63 = vector.shape_cast %61 : vector<1x256xi1> to vector<1x256xi1>
    %64 = vector.broadcast %63 : vector<1x256xi1> to vector<4x256xi1>
    %65 = arith.select %64, %60, %62 : vector<4x256xi1>, vector<4x256xf32>
    %c24 = arith.constant 24 : index
    %c0_22 = arith.constant 0 : index
    %66 = vector.load %arg5[%c24, %c0_22] : memref<36x256xf32, #tpu.memory_space<vmem>>, vector<4x256xf32>
    tpu.vector_store %arg5[%c24, %c0_22], %65 {strides = array<i32>} : memref<36x256xf32, #tpu.memory_space<vmem>>, vector<4x256xf32>,
    %c240_i32_23 = arith.constant 240 : i32
    %67 = tpu.dynamic_rotate %26 by %c240_i32_23 dim 1 : vector<4x256xf32>, i32 -> vector<4x256xf32>
    %cst_24 = arith.constant 0.000000e+00 : f32
    %68 = vector.broadcast %cst_24 : f32 to vector<4x256xf32>
    %69 = vector.shape_cast %20 : vector<1x256xi1> to vector<1x256xi1>
    %70 = vector.broadcast %69 : vector<1x256xi1> to vector<4x256xi1>
    %71 = arith.select %70, %67, %68 : vector<4x256xi1>, vector<4x256xf32>
    %c28 = arith.constant 28 : index
    %c0_25 = arith.constant 0 : index
    %72 = vector.load %arg5[%c28, %c0_25] : memref<36x256xf32, #tpu.memory_space<vmem>>, vector<4x256xf32>
    tpu.vector_store %arg5[%c28, %c0_25], %71 {strides = array<i32>} : memref<36x256xf32, #tpu.memory_space<vmem>>, vector<4x256xf32>,
    %c239_i32 = arith.constant 239 : i32
    %73 = tpu.dynamic_rotate %26 by %c239_i32 dim 1 : vector<4x256xf32>, i32 -> vector<4x256xf32>
    %74 = arith.andi %20, %24 : vector<1x256xi1>
    %cst_26 = arith.constant 0.000000e+00 : f32
    %75 = vector.broadcast %cst_26 : f32 to vector<4x256xf32>
    %76 = vector.shape_cast %74 : vector<1x256xi1> to vector<1x256xi1>
    %77 = vector.broadcast %76 : vector<1x256xi1> to vector<4x256xi1>
    %78 = arith.select %77, %73, %75 : vector<4x256xi1>, vector<4x256xf32>
    %c32 = arith.constant 32 : index
    %c0_27 = arith.constant 0 : index
    %79 = vector.load %arg5[%c32, %c0_27] : memref<36x256xf32, #tpu.memory_space<vmem>>, vector<4x256xf32>
    tpu.vector_store %arg5[%c32, %c0_27], %78 {strides = array<i32>} : memref<36x256xf32, #tpu.memory_space<vmem>>, vector<4x256xf32>,
    %c0_28 = arith.constant 0 : index
    %c0_29 = arith.constant 0 : index
    %80 = vector.load %arg2[%c0_28, %c0_29] : memref<8x36xf32, #tpu.memory_space<vmem>>, vector<8x36xf32>
    %c0_30 = arith.constant 0 : index
    %c0_31 = arith.constant 0 : index
    %81 = vector.load %arg5[%c0_30, %c0_31] : memref<36x256xf32, #tpu.memory_space<vmem>>, vector<36x256xf32>
    %cst_32 = arith.constant dense<0.000000e+00> : vector<8x256xf32>
    %82 = tpu.matmul %80, %81, %cst_32 {dimension_numbers = #tpu.dot_dimension_numbers<[1], [0], [0], [1], [0, 0, 1, 1], [], []>} : vector<8x36xf32>, vector<36x256xf32>, vector<8x256xf32> -> vector<8x256xf32>
    %c0_33 = arith.constant 0 : index
    %c0_34 = arith.constant 0 : index
    %83 = vector.load %arg3[%c0_33, %c0_34] : memref<8x1xf32, #tpu.memory_space<vmem>>, vector<8x1xf32>
    %84 = vector.broadcast %83 : vector<8x1xf32> to vector<8x256xf32>
    %85 = arith.addf %82, %84 : vector<8x256xf32>
    %c0_35 = arith.constant 0 : index
    %c0_36 = arith.constant 0 : index
    %c0_37 = arith.constant 0 : index
    %86 = vector.load %arg4[%c0_35, %c0_36, %c0_37] : memref<1x8x256xf32, #tpu.memory_space<vmem>>, vector<1x8x256xf32>
    %87 = vector.shape_cast %86 : vector<1x8x256xf32> to vector<8x256xf32>
    %88 = vector.shape_cast %85 : vector<8x256xf32> to vector<1x8x256xf32>
    tpu.vector_store %arg4[%c0_35, %c0_36, %c0_37], %88 {strides = array<i32>} : memref<1x8x256xf32, #tpu.memory_space<vmem>>, vector<1x8x256xf32>,
    return
  }
  func.func @transform_0(%arg0: i32) -> (i32, i32, i32) {
    %c0_i32 = arith.constant 0 : i32
    %c0_i32_0 = arith.constant 0 : i32
    %c0_i32_1 = arith.constant 0 : i32
    return %arg0, %c0_i32, %c0_i32_0 : i32, i32, i32
  }
  func.func @transform_1(%arg0: i32) -> (i32, i32) {
    %c0_i32 = arith.constant 0 : i32
    %c0_i32_0 = arith.constant 0 : i32
    %c0_i32_1 = arith.constant 0 : i32
    return %c0_i32, %c0_i32_0 : i32, i32
  }
  func.func @transform_2(%arg0: i32) -> (i32, i32) {
    %c0_i32 = arith.constant 0 : i32
    %c0_i32_0 = arith.constant 0 : i32
    %c0_i32_1 = arith.constant 0 : i32
    return %c0_i32, %c0_i32_0 : i32, i32
  }
  func.func @transform_3(%arg0: i32) -> (i32, i32, i32) {
    %c0_i32 = arith.constant 0 : i32
    %c0_i32_0 = arith.constant 0 : i32
    %c0_i32_1 = arith.constant 0 : i32
    return %arg0, %c0_i32, %c0_i32_0 : i32, i32, i32
  }
}

</mosaic_0001>

<bundles_post_ra>
// kernel: outconv_forward.1
= control target key start
LH: loop header
LB: loop body
LE: loop exit
PB: predicated region body
PF: predicated region fallthrough
CT: control target
= control target key end

     0   :  { %s602_s12 = smov 0   ;;  %s702_s0 = inlined_call_operand.vmem [shape: f32[2,4,256], index: 0, kind: input, shape index: {}]   ;;  %s703_s1 = inlined_call_operand.vmem [shape: f32[8,36], index: 1, kind: input, shape index: {}]   ;;  %s704_s2 = inlined_call_operand.vmem [shape: f32[8,1], index: 2, kind: input, shape index: {}]   ;;  %s705_s3 = inlined_call_operand.vmem [shape: f32[2,8,256], index: 3, kind: output, shape index: {}]  }
   0x1 LB: > { %s520_s13 = sadd.s32 4294967295, %s570_s12   ;;  %p524_p0 = scmp.ge.s32.totalorder %s570_s12, 1  ;;  %s570_s12 = sphi %s602_s12, %s13_s12  }
   0x2   : > { %p137_p1 = scmp.lt.s32.totalorder %s570_s12, 3 }
   0x4   : > { %p138_p2 = pnand %p524_p0, %p137_p1 }
   0x5   : > { %p161_p3 = scmp.lt.s32.totalorder (!%p138_p2), %s520_s13, 1  ;;  %s572_s18 = smov (!%p138_p2), 16   ;;  %v580_v2 = vmov (!%p138_p2), 0.0   ;;  %v375_v3 = vld [vmem:[%s704_s2] sm:$0xff] (!%p138_p2)  ;;  %v581_v4 = vmov (!%p138_p2), 0   ;;  %v171_v5 = vlaneseq (!%p138_p2) }
   0x6   : > { %141 = sbr.rel (%p138_p2) target bundleno = 390 (0x186), region = 32  ;;  %s573_s19 = smov (!%p138_p2), 1   ;;  %456 = vmatprep.mubr.f32.mxu0 (!%p138_p2), %v580_v2  ;;  %562 = vset.pattern.permute.xlu0 (!%p138_p2), %v581_v4 }
   0x7   : > { %s574_s20 = smov (!%p138_p2), 17   ;;  %s575_s21 = smov (!%p138_p2), 15   ;;  %v619_v6 = vand.u32 (!%p138_p2), 127, %v171_v5 }
   0x8   : > { %s576_s22 = smov (!%p138_p2), 127   ;;  %s577_s23 = smov (!%p138_p2), 112  }
   0x9   : > { %s578_s24 = smov (!%p138_p2), 113   ;;  %s579_s25 = smov (!%p138_p2), 111   ;;  %v622_v7 = vadd.s32 (!%p138_p2), 128, %v619_v6  ;;  %v178_v10 = vand.u32 (!%p138_p2), 15, %v619_v6  ;;  %vm231_vm0 = vcmp.lt.s32.totalorder (!%p138_p2), %v619_v6, 16  ;;  %vm198_vm1 = vcmp.ge.s32.totalorder (!%p138_p2), %v619_v6, 16 }
   0xa   : > { %vm214_vm3 = vcmp.lt.s32.totalorder (!%p138_p2), %v619_v6, 17  ;;  %vm269_vm4 = vcmp.lt.s32.totalorder (!%p138_p2), %v619_v6, 1  ;;  %vm252_vm8 = vcmp.lt.s32.totalorder (!%p138_p2), %v619_v6, 15  ;;  %vm292_vm11 = vcmp.lt.s32.totalorder (!%p138_p2), %v619_v6, 127 }
   0xb   : > { %v185_v11 = vand.u32 (!%p138_p2), 15, %v622_v7  ;;  %vm628_vm2 = vcmp.ge.s32.totalorder (!%p138_p2), %v178_v10, 1  ;;  %vm644_vm7 = vcmp.lt.s32.totalorder (!%p138_p2), %v178_v10, 15  ;;  %vm330_vm12 = vcmp.lt.s32.totalorder (!%p138_p2), %v619_v6, 112 }
   0xc   : > { %vm217_vm6 = vmand (!%p138_p2), %vm198_vm1, %vm628_vm2  ;;  %vm201_vm13 = vcmp.lt.s32.totalorder (!%p138_p2), %v622_v7, 240  ;;  %vm313_vm14 = vcmp.lt.s32.totalorder (!%p138_p2), %v619_v6, 113 }
   0xd   : > { %s715_s13 = smov (!%p161_p3, %s520_s13), 1  ;;  %vm636_vm5 = vcmp.ge.s32.totalorder %v185_v11, 1  ;;  %vm655_vm9 = vcmp.lt.s32.totalorder %v185_v11, 15  ;;  %vm255_vm10 = vmand %vm198_vm1, %vm644_vm7 }
   0xe   : > { %s534_s14 = sshll.u32 %s715_s13, 3  ;;  %vm317_vm15 = vmand %vm201_vm13, %vm636_vm5  ;;  %s535_s30 = sshll.u32 %s715_s13, 4 }
   0xf   : > { %s165_s17 = scalar_lea.vmem %s702_s0, %s534_s14  ;;  %s170_s6 = scalar_lea.vmem %s705_s3, %s535_s30 }
  0x10   : > { %v206_v0 = vld [vmem:[%s165_s17] sm:$0xff] }
  0x11   : > { %227 = vrot.lane.b32.xlu1 %v206_v0, %s572_s18  ;;  %286 = vst [vmem:[#allocation2 + $0x20] sm:$0xf] %v206_v0  ;;  %265 = vrot.lane.b32.xlu0 %v206_v0, %s573_s19  ;;  %v208_v1 = vcombine.high %v206_v0, %v206_v0 }
  0x13   : > { %287 = vst [vmem:[#allocation2 + $0x28] sm:$0xf] %v208_v1 }
  0x15   : > { %210 = vrot.lane.b32.xlu0 %v206_v0, %s574_s20  ;;  %229 = vrot.lane.b32.xlu1 %v208_v1, %s572_s18 }
  0x19   : > { %212 = vrot.lane.b32.xlu1 %v208_v1, %s574_s20  ;;  %267 = vrot.lane.b32.xlu0 %v208_v1, %s573_s19 }
  0x1d   : > { %250 = vrot.lane.b32.xlu1 %v208_v1, %s575_s21  ;;  %248 = vrot.lane.b32.xlu0 %v206_v0, %s575_s21 }
  0x21   : > { %290 = vrot.lane.b32.xlu1 %v208_v1, %s576_s22  ;;  %288 = vrot.lane.b32.xlu0 %v206_v0, %s576_s22 }
  0x25   : > { %328 = vrot.lane.b32.xlu1 %v208_v1, %s577_s23  ;;  %326 = vrot.lane.b32.xlu0 %v206_v0, %s577_s23 }
  0x29   : > { %311 = vrot.lane.b32.xlu1 %v208_v1, %s578_s24  ;;  %309 = vrot.lane.b32.xlu0 %v206_v0, %s578_s24 }
  0x2d   : > { %349 = vrot.lane.b32.xlu1 %v208_v1, %s579_s25  ;;  %347 = vrot.lane.b32.xlu0 %v206_v0, %s579_s25 }
  0x31   : > { %378 = vperm.xlu0 %562, %v375_v3  }
  0x83   : > { %v228_v8 = vpop.permute.xlu1 %227  ;;  %v266_v9 = vpop.permute.xlu0 %265 }
  0x87   : > { %v211_v12 = vpop.permute.xlu0 %210  ;;  %v230_v13 = vpop.permute.xlu1 %229 }
  0x88   : > { %v232_v15 = vsel %vm231_vm0, %v228_v8, %v230_v13  ;;  %v233_v16 = vsel %vm231_vm0, %v230_v13, %v228_v8  ;;  %vm351_vm0 = vcmp.lt.s32.totalorder %v619_v6, 111 }
  0x89   : > { %v238_v17 = vsel %vm198_vm1, %v233_v16, 0.0  ;;  %v243_v18 = vrot.slane %v232_v15, 4  ;;  %vm355_vm1 = vmand %vm201_vm13, %vm655_vm9 }
  0x8a   : > { %v242_v19 = vrot.slane %v238_v17, 4 }
  0x8b   : > { %247 = vst [vmem:[#allocation2 + $0x8] sm:$0xf0] %v243_v18  ;;  %v213_v21 = vpop.permute.xlu1 %212  ;;  %v268_v22 = vpop.permute.xlu0 %267  ;;  %v364_v18 = vld [vmem:[%s703_s1] sm:$0xff] }
  0x8c   : > { %246 = vst [vmem:[#allocation2] sm:$0xf0] %v242_v19  ;;  %v215_v24 = vsel %vm214_vm3, %v211_v12, %v213_v21  ;;  %v216_v25 = vsel %vm214_vm3, %v213_v21, %v211_v12  ;;  %v270_v26 = vsel %vm269_vm4, %v266_v9, %v268_v22  ;;  %v271_v27 = vsel %vm269_vm4, %v268_v22, %v266_v9 }
  0x8d   : > { %v223_v28 = vsel %vm217_vm6, %v216_v25, 0.0  ;;  %v224_v29 = vsel %vm636_vm5, %v215_v24, 0.0  ;;  %v276_v30 = vsel %vm628_vm2, %v271_v27, 0.0  ;;  %v277_v31 = vsel %vm636_vm5, %v270_v26, 0.0 }
  0x8e   : > { %225 = vst [vmem:[#allocation2] sm:$0xf] %v223_v28  ;;  %226 = vst [vmem:[#allocation2 + $0x8] sm:$0xf] %v224_v29  ;;  %v280_v32 = vrot.slane %v276_v30, 4  ;;  %v281_v33 = vrot.slane %v277_v31, 4 }
  0x8f   : > { %v251_v35 = vpop.permute.xlu1 %250  ;;  %v249_v36 = vpop.permute.xlu0 %248  ;;  %vm381_vm3 = vcmask 293888  }
  0x90   : > { %284 = vst [vmem:[#allocation2 + $0x10] sm:$0xf0] %v280_v32  ;;  %285 = vst [vmem:[#allocation2 + $0x18] sm:$0xf0] %v281_v33  ;;  %v253_v37 = vsel %vm252_vm8, %v249_v36, %v251_v35  ;;  %v254_v38 = vsel %vm252_vm8, %v251_v35, %v249_v36 }
  0x91   : > { %v261_v39 = vsel %vm255_vm10, %v254_v38, 0.0  ;;  %v262_v40 = vsel %vm655_vm9, %v253_v37, 0.0 }
  0x92   : > { %263 = vst [vmem:[#allocation2 + $0x10] sm:$0xf] %v261_v39  ;;  %264 = vst [vmem:[#allocation2 + $0x18] sm:$0xf] %v262_v40 }
  0x93   : > { %v291_v41 = vpop.permute.xlu1 %290  ;;  %v289_v42 = vpop.permute.xlu0 %288 }
  0x94   : > { %v293_v43 = vsel %vm292_vm11, %v289_v42, %v291_v41  ;;  %v294_v44 = vsel %vm292_vm11, %v291_v41, %v289_v42 }
  0x95   : > { %v299_v45 = vsel %vm644_vm7, %v293_v43, 0.0  ;;  %v300_v46 = vsel %vm655_vm9, %v294_v44, 0.0  ;;  %v366_v53 = vld [vmem:[#allocation2 + $0x8] sm:$0xff]  ;;  %v365_v57 = vld [vmem:[#allocation2] sm:$0xff] }
  0x96   : > { %v303_v47 = vrot.slane %v299_v45, 4  ;;  %v304_v48 = vrot.slane %v300_v46, 4 }
  0x97   : > { %v329_v49 = vpop.permute.xlu1 %328  ;;  %v327_v50 = vpop.permute.xlu0 %326 }
  0x98   : > { %307 = vst [vmem:[#allocation2 + $0x20] sm:$0xf0] %v303_v47  ;;  %308 = vst [vmem:[#allocation2 + $0x28] sm:$0xf0] %v304_v48  ;;  %v331_v51 = vsel %vm330_vm12, %v327_v50, %v329_v49  ;;  %v332_v52 = vsel %vm330_vm12, %v329_v49, %v327_v50 }
  0x99   : > { %v338_v54 = vsel %vm201_vm13, %v332_v52, 0.0  ;;  %v341_v55 = vrot.slane %v331_v51, 4  ;;  %v368_v56 = vld [vmem:[#allocation2 + $0x18] sm:$0xff]  ;;  %v367_v58 = vld [vmem:[#allocation2 + $0x10] sm:$0xff] }
  0x9a   : > { %v342_v59 = vrot.slane %v338_v54, 4  ;;  %v536_v60 = vpack.c.bf16 %v368_v56, %v366_v53  ;;  %v538_v61 = vpack.c.bf16 %v367_v58, %v365_v57 }
  0x9b   : > { %345 = vst [vmem:[#allocation2 + $0x30] sm:$0xf0] %v341_v55  ;;  %v312_v62 = vpop.permute.xlu1 %311  ;;  %v310_v63 = vpop.permute.xlu0 %309 }
  0x9c   : > { %346 = vst [vmem:[#allocation2 + $0x38] sm:$0xf0] %v342_v59  ;;  %v314_v0 = vsel %vm313_vm14, %v310_v63, %v312_v62  ;;  %v315_v1 = vsel %vm313_vm14, %v312_v62, %v310_v63  ;;  %537 = vmatprep.subr.bf16.mxu0 %v536_v60 }
  0x9d   : > { %v322_v2 = vsel %vm628_vm2, %v314_v0, 0.0  ;;  %v323_v3 = vsel %vm317_vm15, %v315_v1, 0.0  ;;  %539 = vmatpush1.bf16.msra.mxu0 %v538_v61  ;;  %vm385_vm2 = vcmask 1043456  }
  0x9e   : > { %324 = vst [vmem:[#allocation2 + $0x30] sm:$0xf] %v322_v2  ;;  %325 = vst [vmem:[#allocation2 + $0x38] sm:$0xf] %v323_v3 }
  0x9f   : > { %v350_v4 = vpop.permute.xlu1 %349  ;;  %v348_v5 = vpop.permute.xlu0 %347  ;;  %v370_v12 = vld [vmem:[#allocation2 + $0x28] sm:$0xff]  ;;  %v369_v13 = vld [vmem:[#allocation2 + $0x20] sm:$0xff] }
  0xa0   : > { %v352_v8 = vsel %vm351_vm0, %v348_v5, %v350_v4  ;;  %v353_v9 = vsel %vm351_vm0, %v350_v4, %v348_v5 }
  0xa1   : > { %v360_v10 = vsel %vm644_vm7, %v352_v8, 0.0  ;;  %v361_v11 = vsel %vm355_vm1, %v353_v9, 0.0 }
  0xa2   : > { %362 = vst [vmem:[#allocation2 + $0x40] sm:$0xf] %v360_v10  ;;  %363 = vst [vmem:[#allocation2 + $0x48] sm:$0xf] %v361_v11 }
  0xa5   : > { %v372_v6 = vld [vmem:[#allocation2 + $0x38] sm:$0xff]  ;;  %v371_v14 = vld [vmem:[#allocation2 + $0x30] sm:$0xff] }
  0xa6   : > { %v540_v15 = vpack.c.bf16 %v372_v6, %v370_v12  ;;  %v542_v16 = vpack.c.bf16 %v371_v14, %v369_v13 }
  0xa8   : > { %541 = vmatprep.subr.bf16.mxu0 %v540_v15 }
  0xa9   : > { %543 = vmatpush1.bf16.msra.mxu0 %v542_v16  ;;  %v374_v7 = vld [vmem:[#allocation2 + $0x48] sm:$0xf]  ;;  %v373_v17 = vld [vmem:[#allocation2 + $0x40] sm:$0xf] }
  0xaa   : > { %529 = vmatprep.subr.msk.mxu0 %vm385_vm2, %v374_v7 }
  0xad   : > { %530 = vmatpush1.msk.msra.mxu0 %vm385_vm2, %v373_v17 }
  0xae   : > { %531 = vmatmul.mubr.msk.f32.vlgmr.msra.gmra.mrb[0].mxu0 %vm381_vm3, %v364_v18 }
  0xb0   : > { %v379_v19 = vpop.permute.xlu0 %378 }
 0x181   : > { %v458_v20 = vpop.f32.mrb[0].mxu0 }
 0x182   : > { %v459_v21 = vadd.f32 %v458_v20, %v379_v19  ;;  %v460_v22 = vpop.f32.mrb[1].mxu0 }
 0x183   : > { %v461_v23 = vadd.f32 %v460_v22, %v379_v19 }
 0x184   : > { %463 = vst [vmem:[%s170_s6] sm:$0xff] %v459_v21 }
 0x185   : > { %464 = vst [vmem:[%s170_s6 + $0x8] sm:$0xff] %v461_v23 }
 0x186 PF: > { %s13_s12 = sadd.s32 1, %s570_s12  }
 0x187   : > { %p10_p4 = scmp.ge.s32.totalorder %s13_s12, 4  }
 0x189   :  { %12 = sbr.rel (!%p10_p4) target bundleno = 1 (0x1), region = 62 }

</bundles_post_ra>
